<compile_context>
chip_gen: v6e
topology: v6e:2x2x1
jax: 0.10.0
libtpu: 0.0.40
codegen_flags: <defaults>
</compile_context>

<pallas_src>
import functools

import jax
import jax.numpy as jnp
from jax import lax
from jax.experimental import pallas as pl
from jax.experimental.pallas import tpu as pltpu


def _round_up(a, b):
    return (a + b - 1) // b * b


def _ema_cov_kernel(momentum, center, n_true,
                    is_init_ref,                        # scalar prefetch (SMEM)
                    x_ref, y_ref,                       # (TN, D) batch tiles
                    mean_x_ref, mean_y_ref,             # (1, D) old means
                    cov_x_ref, cov_y_ref, cov_xy_ref,   # (D, D) old covariances
                    new_mean_x_ref, new_mean_y_ref,     # (1, D) outputs
                    new_cov_x_ref, new_cov_y_ref, new_cov_xy_ref,   # (D, D) outputs
                    s_x_ref, s_y_ref,                   # (1, D) f32 scratch
                    g_xx_ref, g_yy_ref, g_xy_ref):      # (D, D) f32 scratch
    f32 = jnp.float32
    contract0 = (((0,), (0,)), ((), ()))   # A^T B without materializing A.T

    @pl.when(pl.program_id(0) == 0)
    def _init():
        s_x_ref[...] = jnp.zeros_like(s_x_ref)
        s_y_ref[...] = jnp.zeros_like(s_y_ref)
        g_xx_ref[...] = jnp.zeros_like(g_xx_ref)
        g_yy_ref[...] = jnp.zeros_like(g_yy_ref)
        g_xy_ref[...] = jnp.zeros_like(g_xy_ref)

    x = x_ref[...]
    y = y_ref[...]

    # Row sums (f32) for the means — cross-sublane reduce on the XLU.
    s_x_ref[...] += jnp.sum(x.astype(f32), axis=0, keepdims=True)
    s_y_ref[...] += jnp.sum(y.astype(f32), axis=0, keepdims=True)

    # Uncentered Gram accumulation on the MXU, contracting the batch axis
    # directly (transpose-free), accumulating in f32.
    g_xx_ref[...] += lax.dot_general(x, x, contract0, preferred_element_type=f32)
    g_yy_ref[...] += lax.dot_general(y, y, contract0, preferred_element_type=f32)
    g_xy_ref[...] += lax.dot_general(x, y, contract0, preferred_element_type=f32)

    @pl.when(pl.program_id(0) == pl.num_programs(0) - 1)
    def _finalize():
        d = s_x_ref.shape[1]
        inv_n = f32(1.0 / n_true)
        n_f = f32(n_true)

        # Blend weights: first call -> copy batch stats; later calls -> EMA.
        init = is_init_ref[0] != 0
        w_old = jnp.where(init, f32(1.0 - momentum), f32(0.0))
        # Fold 1/N into the "new" blend weight: one scale per D^2 buffer.
        w_new_over_n = jnp.where(init, f32(momentum), f32(1.0)) * inv_n

        s_x = s_x_ref[...]
        s_y = s_y_ref[...]
        m_x = w_old * mean_x_ref[...] + w_new_over_n * s_x   # blended means
        m_y = w_old * mean_y_ref[...] + w_new_over_n * s_y
        new_mean_x_ref[...] = m_x
        new_mean_y_ref[...] = m_y

        if center:
            # Rank-2 centering correction as a tiny (8,D)^T (8,D) matmul:
            #   Xc^T Yc = G_xy + (-S_x)^T m_y + m_x^T (N m_y - S_y)
            ridx = lax.broadcasted_iota(jnp.int32, (8, d), 0)
            zeros8 = jnp.zeros((8, d), f32)

            def stack2(r0, r1):
                out = jnp.where(ridx == 0, jnp.broadcast_to(r0, (8, d)), zeros8)
                return jnp.where(ridx == 1, jnp.broadcast_to(r1, (8, d)), out)

            u_x = stack2(-s_x, m_x)
            u_y = stack2(-s_y, m_y)
            v_x = stack2(m_x, n_f * m_x - s_x)
            v_y = stack2(m_y, n_f * m_y - s_y)

            gc_xx = g_xx_ref[...] + lax.dot_general(
                u_x, v_x, contract0, preferred_element_type=f32)
            gc_yy = g_yy_ref[...] + lax.dot_general(
                u_y, v_y, contract0, preferred_element_type=f32)
            gc_xy = g_xy_ref[...] + lax.dot_general(
                u_x, v_y, contract0, preferred_element_type=f32)
        else:
            gc_xx = g_xx_ref[...]
            gc_yy = g_yy_ref[...]
            gc_xy = g_xy_ref[...]

        new_cov_x_ref[...] = w_old * cov_x_ref[...] + w_new_over_n * gc_xx
        new_cov_y_ref[...] = w_old * cov_y_ref[...] + w_new_over_n * gc_yy
        new_cov_xy_ref[...] = w_old * cov_xy_ref[...] + w_new_over_n * gc_xy


def ema_covariance_forward(X, Y, mean_X, mean_Y, cov_X, cov_Y, cov_XY,
                           is_initialized, *, momentum=0.01, center=True,
                           block_n=None):
    """Functional equivalent of EMACovariance.forward (training mode).

    Returns the updated buffers:
      (mean_X, mean_Y, cov_X, cov_Y, cov_XY, is_initialized)
    """
    assert X.ndim == 2 and X.shape == Y.shape
    N, D = X.shape
    assert mean_X.shape == (D,)

    # Batch tile (multiple of 8 for the sublane constraint). Zero-padded rows
    # contribute nothing to the sums / Gram products, so padding is exact.
    if block_n is None:
        tn = min(512, _round_up(N, 8))
    else:
        tn = max(8, _round_up(min(int(block_n), N), 8))
    n_pad = _round_up(N, tn)
    if n_pad != N:
        pad = ((0, n_pad - N), (0, 0))
        Xp, Yp = jnp.pad(X, pad), jnp.pad(Y, pad)
    else:
        Xp, Yp = X, Y
    grid = (n_pad // tn,)

    mean_X2 = mean_X.reshape(1, D).astype(jnp.float32)
    mean_Y2 = mean_Y.reshape(1, D).astype(jnp.float32)
    cov_X = cov_X.astype(jnp.float32)
    cov_Y = cov_Y.astype(jnp.float32)
    cov_XY = cov_XY.astype(jnp.float32)
    is_init = jnp.asarray(is_initialized, jnp.int32).reshape(1)

    kernel = functools.partial(_ema_cov_kernel, float(momentum), bool(center),
                               int(N))

    x_spec = pl.BlockSpec((tn, D), lambda i, s: (i, 0))
    row_spec = pl.BlockSpec((1, D), lambda i, s: (0, 0))
    mat_spec = pl.BlockSpec((D, D), lambda i, s: (0, 0))

    out_shapes = (
        jax.ShapeDtypeStruct((1, D), jnp.float32),   # mean_X
        jax.ShapeDtypeStruct((1, D), jnp.float32),   # mean_Y
        jax.ShapeDtypeStruct((D, D), jnp.float32),   # cov_X
        jax.ShapeDtypeStruct((D, D), jnp.float32),   # cov_Y
        jax.ShapeDtypeStruct((D, D), jnp.float32),   # cov_XY
    )

    grid_spec = pltpu.PrefetchScalarGridSpec(
        num_scalar_prefetch=1,
        grid=grid,
        in_specs=[x_spec, x_spec,
                  row_spec, row_spec,
                  mat_spec, mat_spec, mat_spec],
        out_specs=[row_spec, row_spec, mat_spec, mat_spec, mat_spec],
        scratch_shapes=[pltpu.VMEM((1, D), jnp.float32)] * 2
                       + [pltpu.VMEM((D, D), jnp.float32)] * 3,
    )

    itemsize = jnp.dtype(Xp.dtype).itemsize
    cost = pl.CostEstimate(
        flops=int(6 * n_pad * D * D),
        transcendentals=0,
        bytes_accessed=int(2 * n_pad * D * itemsize + (8 * D * D + 4 * D) * 4),
    )
    # Double-buffered X/Y tiles + cov/mean in/out blocks + f32 scratch.
    vmem_est = 4 * tn * D * itemsize + (12 * D * D + 16 * D) * 4
    vmem_limit = int(min(100 * 2 ** 20, max(2 * vmem_est, 8 * 2 ** 20)))

    outs = pl.pallas_call(
        kernel,
        out_shape=out_shapes,
        grid_spec=grid_spec,
        # Alias old state -> new state (index 0 is the scalar-prefetch flag).
        input_output_aliases={3: 0, 4: 1, 5: 2, 6: 3, 7: 4},
        compiler_params=pltpu.CompilerParams(
            dimension_semantics=("arbitrary",),
            vmem_limit_bytes=vmem_limit),
        cost_estimate=cost,
    )(is_init, Xp, Yp, mean_X2, mean_Y2, cov_X, cov_Y, cov_XY)

    new_mean_X, new_mean_Y, new_cov_X, new_cov_Y, new_cov_XY = outs
    return (new_mean_X.reshape(D), new_mean_Y.reshape(D),
            new_cov_X, new_cov_Y, new_cov_XY,
            jnp.asarray(True))


def _reference_forward(X, Y, mean_X, mean_Y, cov_X, cov_Y, cov_XY,
                       is_initialized, momentum=0.01, center=True):
    """Pure-JAX port of the PyTorch module, for verification."""
    X = X.astype(jnp.float32)
    Y = Y.astype(jnp.float32)
    N = X.shape[0]
    bmx = jnp.mean(X, axis=0)
    bmy = jnp.mean(Y, axis=0)
    if not bool(is_initialized):
        new_mean_X, new_mean_Y = bmx, bmy
    else:
        a = 1.0 - momentum
        new_mean_X = a * mean_X + momentum * bmx
        new_mean_Y = a * mean_Y + momentum * bmy
    Xc = X - new_mean_X if center else X
    Yc = Y - new_mean_Y if center else Y
    cX = Xc.T @ Xc / N
    cY = Yc.T @ Yc / N
    cXY = Xc.T @ Yc / N
    if not bool(is_initialized):
        return new_mean_X, new_mean_Y, cX, cY, cXY, True
    a = 1.0 - momentum
    return (new_mean_X, new_mean_Y,
            a * cov_X + momentum * cX,
            a * cov_Y + momentum * cY,
            a * cov_XY + momentum * cXY, True)


if __name__ == "__main__":
    D = 32
    momentum, center = 0.01, True

    key = jax.random.PRNGKey(0)
    keys = jax.random.split(key, 6)
    batches = [
        (jax.random.normal(keys[0], (8, D), jnp.float32),
         jax.random.normal(keys[1], (8, D), jnp.float32)),
        (jax.random.normal(keys[2], (16, D), jnp.float32),
         jax.random.normal(keys[3], (16, D), jnp.float32)),
        (jax.random.normal(keys[4], (20, D), jnp.float32),   # exercises padding
         jax.random.normal(keys[5], (20, D), jnp.float32)),
    ]
    # Force a multi-step grid on the last (padded) batch to exercise the
    # accumulate-across-tiles path even at tiny shapes.
    block_ns = [None, None, 8]

    init_state = (jnp.zeros((D,), jnp.float32), jnp.zeros((D,), jnp.float32),
                  jnp.eye(D, dtype=jnp.float32), jnp.eye(D, dtype=jnp.float32),
                  jnp.eye(D, dtype=jnp.float32), False)

    # Pure-JAX reference chain first.
    ref_state = init_state
    for Xb, Yb in batches:
        ref_state = _reference_forward(Xb, Yb, *ref_state,
                                       momentum=momentum, center=center)

    # Pallas kernel chain: first forward (init path) then EMA path twice.
    state = init_state
    for (Xb, Yb), bn in zip(batches, block_ns):
        state = ema_covariance_forward(Xb, Yb, *state,
                                       momentum=momentum, center=center,
                                       block_n=bn)
    state = jax.block_until_ready(state)

    for got, want in zip(state[:5], ref_state[:5]):
        if not jnp.allclose(got, jnp.asarray(want), atol=1e-4, rtol=1e-4):
            raise AssertionError("Pallas EMACovariance mismatch vs reference")

    print("KERNEL_OK")
</pallas_src>

<mosaic_0001>
module attributes {stable_mosaic.version = 11 : i64} {
  func.func @_ema_cov_kernel(%arg0: i32, %arg1: memref<1xi32, #tpu.memory_space<smem>>, %arg2: memref<8x32xf32, #tpu.memory_space<vmem>>, %arg3: memref<8x32xf32, #tpu.memory_space<vmem>>, %arg4: memref<1x32xf32, #tpu.memory_space<vmem>>, %arg5: memref<1x32xf32, #tpu.memory_space<vmem>>, %arg6: memref<32x32xf32, #tpu.memory_space<vmem>>, %arg7: memref<32x32xf32, #tpu.memory_space<vmem>>, %arg8: memref<32x32xf32, #tpu.memory_space<vmem>>, %arg9: memref<1x32xf32, #tpu.memory_space<vmem>>, %arg10: memref<1x32xf32, #tpu.memory_space<vmem>>, %arg11: memref<32x32xf32, #tpu.memory_space<vmem>>, %arg12: memref<32x32xf32, #tpu.memory_space<vmem>>, %arg13: memref<32x32xf32, #tpu.memory_space<vmem>>, %arg14: memref<1x32xf32, #tpu.memory_space<vmem>>, %arg15: memref<1x32xf32, #tpu.memory_space<vmem>>, %arg16: memref<32x32xf32, #tpu.memory_space<vmem>>, %arg17: memref<32x32xf32, #tpu.memory_space<vmem>>, %arg18: memref<32x32xf32, #tpu.memory_space<vmem>>) attributes {dimension_semantics = [#tpu.dimension_semantics<arbitrary>], iteration_bounds = array<i64: 1>, scalar_prefetch = 1 : i64, scratch_operands = 5 : i64, tpu.core_type = #tpu.core_type<tc>, window_params = [{transform_indices = @transform_0, window_bounds = array<i64: 8, 32>}, {transform_indices = @transform_1, window_bounds = array<i64: 8, 32>}, {pipeline_mode = #tpu.pipeline_mode<synchronous>, transform_indices = @transform_2, window_bounds = array<i64: 1, 32>}, {pipeline_mode = #tpu.pipeline_mode<synchronous>, transform_indices = @transform_3, window_bounds = array<i64: 1, 32>}, {pipeline_mode = #tpu.pipeline_mode<synchronous>, transform_indices = @transform_4, window_bounds = array<i64: 32, 32>}, {pipeline_mode = #tpu.pipeline_mode<synchronous>, transform_indices = @transform_5, window_bounds = array<i64: 32, 32>}, {pipeline_mode = #tpu.pipeline_mode<synchronous>, transform_indices = @transform_6, window_bounds = array<i64: 32, 32>}, {pipeline_mode = #tpu.pipeline_mode<synchronous>, transform_indices = @transform_7, window_bounds = array<i64: 1, 32>}, {pipeline_mode = #tpu.pipeline_mode<synchronous>, transform_indices = @transform_8, window_bounds = array<i64: 1, 32>}, {pipeline_mode = #tpu.pipeline_mode<synchronous>, transform_indices = @transform_9, window_bounds = array<i64: 32, 32>}, {pipeline_mode = #tpu.pipeline_mode<synchronous>, transform_indices = @transform_10, window_bounds = array<i64: 32, 32>}, {pipeline_mode = #tpu.pipeline_mode<synchronous>, transform_indices = @transform_11, window_bounds = array<i64: 32, 32>}]} {
    %c0_i32 = arith.constant 0 : i32
    %0 = arith.cmpi eq, %arg0, %c0_i32 : i32
    %1 = arith.extui %0 : i1 to i32
    %c0_i32_0 = arith.constant 0 : i32
    %2 = arith.cmpi ne, %1, %c0_i32_0 : i32
    scf.if %2 {
      %cst_30 = arith.constant 0.000000e+00 : f32
      %30 = vector.broadcast %cst_30 : f32 to vector<1x32xf32>
      %c0_31 = arith.constant 0 : index
      %c0_32 = arith.constant 0 : index
      %31 = vector.load %arg14[%c0_31, %c0_32] : memref<1x32xf32, #tpu.memory_space<vmem>>, vector<1x32xf32>
      tpu.vector_store %arg14[%c0_31, %c0_32], %30 {strides = array<i32>} : memref<1x32xf32, #tpu.memory_space<vmem>>, vector<1x32xf32>,
      %cst_33 = arith.constant 0.000000e+00 : f32
      %32 = vector.broadcast %cst_33 : f32 to vector<1x32xf32>
      %c0_34 = arith.constant 0 : index
      %c0_35 = arith.constant 0 : index
      %33 = vector.load %arg15[%c0_34, %c0_35] : memref<1x32xf32, #tpu.memory_space<vmem>>, vector<1x32xf32>
      tpu.vector_store %arg15[%c0_34, %c0_35], %32 {strides = array<i32>} : memref<1x32xf32, #tpu.memory_space<vmem>>, vector<1x32xf32>,
      %cst_36 = arith.constant 0.000000e+00 : f32
      %34 = vector.broadcast %cst_36 : f32 to vector<32x32xf32>
      %c0_37 = arith.constant 0 : index
      %c0_38 = arith.constant 0 : index
      %35 = vector.load %arg16[%c0_37, %c0_38] : memref<32x32xf32, #tpu.memory_space<vmem>>, vector<32x32xf32>
      tpu.vector_store %arg16[%c0_37, %c0_38], %34 {strides = array<i32>} : memref<32x32xf32, #tpu.memory_space<vmem>>, vector<32x32xf32>,
      %cst_39 = arith.constant 0.000000e+00 : f32
      %36 = vector.broadcast %cst_39 : f32 to vector<32x32xf32>
      %c0_40 = arith.constant 0 : index
      %c0_41 = arith.constant 0 : index
      %37 = vector.load %arg17[%c0_40, %c0_41] : memref<32x32xf32, #tpu.memory_space<vmem>>, vector<32x32xf32>
      tpu.vector_store %arg17[%c0_40, %c0_41], %36 {strides = array<i32>} : memref<32x32xf32, #tpu.memory_space<vmem>>, vector<32x32xf32>,
      %cst_42 = arith.constant 0.000000e+00 : f32
      %38 = vector.broadcast %cst_42 : f32 to vector<32x32xf32>
      %c0_43 = arith.constant 0 : index
      %c0_44 = arith.constant 0 : index
      %39 = vector.load %arg18[%c0_43, %c0_44] : memref<32x32xf32, #tpu.memory_space<vmem>>, vector<32x32xf32>
      tpu.vector_store %arg18[%c0_43, %c0_44], %38 {strides = array<i32>} : memref<32x32xf32, #tpu.memory_space<vmem>>, vector<32x32xf32>,
    } else {
    }
    %c0 = arith.constant 0 : index
    %c0_1 = arith.constant 0 : index
    %3 = vector.load %arg2[%c0, %c0_1] : memref<8x32xf32, #tpu.memory_space<vmem>>, vector<8x32xf32>
    %c0_2 = arith.constant 0 : index
    %c0_3 = arith.constant 0 : index
    %4 = vector.load %arg3[%c0_2, %c0_3] : memref<8x32xf32, #tpu.memory_space<vmem>>, vector<8x32xf32>
    %c0_4 = arith.constant 0 : index
    %c0_5 = arith.constant 0 : index
    %5 = vector.load %arg14[%c0_4, %c0_5] : memref<1x32xf32, #tpu.memory_space<vmem>>, vector<1x32xf32>
    %cst = arith.constant dense<0.000000e+00> : vector<32xf32>
    %6 = vector.multi_reduction <add>, %3, %cst [0] : vector<8x32xf32> to vector<32xf32>
    %7 = vector.shape_cast %6 : vector<32xf32> to vector<1x32xf32>
    %8 = arith.addf %5, %7 : vector<1x32xf32>
    %c0_6 = arith.constant 0 : index
    %c0_7 = arith.constant 0 : index
    %9 = vector.load %arg14[%c0_6, %c0_7] : memref<1x32xf32, #tpu.memory_space<vmem>>, vector<1x32xf32>
    tpu.vector_store %arg14[%c0_6, %c0_7], %8 {strides = array<i32>} : memref<1x32xf32, #tpu.memory_space<vmem>>, vector<1x32xf32>,
    %c0_8 = arith.constant 0 : index
    %c0_9 = arith.constant 0 : index
    %10 = vector.load %arg15[%c0_8, %c0_9] : memref<1x32xf32, #tpu.memory_space<vmem>>, vector<1x32xf32>
    %cst_10 = arith.constant dense<0.000000e+00> : vector<32xf32>
    %11 = vector.multi_reduction <add>, %4, %cst_10 [0] : vector<8x32xf32> to vector<32xf32>
    %12 = vector.shape_cast %11 : vector<32xf32> to vector<1x32xf32>
    %13 = arith.addf %10, %12 : vector<1x32xf32>
    %c0_11 = arith.constant 0 : index
    %c0_12 = arith.constant 0 : index
    %14 = vector.load %arg15[%c0_11, %c0_12] : memref<1x32xf32, #tpu.memory_space<vmem>>, vector<1x32xf32>
    tpu.vector_store %arg15[%c0_11, %c0_12], %13 {strides = array<i32>} : memref<1x32xf32, #tpu.memory_space<vmem>>, vector<1x32xf32>,
    %c0_13 = arith.constant 0 : index
    %c0_14 = arith.constant 0 : index
    %15 = vector.load %arg16[%c0_13, %c0_14] : memref<32x32xf32, #tpu.memory_space<vmem>>, vector<32x32xf32>
    %cst_15 = arith.constant dense<0.000000e+00> : vector<32x32xf32>
    %16 = tpu.matmul %3, %3, %cst_15 {dimension_numbers = #tpu.dot_dimension_numbers<[0], [0], [1], [1], [0, 1, 1, 1], [], []>} : vector<8x32xf32>, vector<8x32xf32>, vector<32x32xf32> -> vector<32x32xf32>
    %17 = arith.addf %15, %16 : vector<32x32xf32>
    %c0_16 = arith.constant 0 : index
    %c0_17 = arith.constant 0 : index
    %18 = vector.load %arg16[%c0_16, %c0_17] : memref<32x32xf32, #tpu.memory_space<vmem>>, vector<32x32xf32>
    tpu.vector_store %arg16[%c0_16, %c0_17], %17 {strides = array<i32>} : memref<32x32xf32, #tpu.memory_space<vmem>>, vector<32x32xf32>,
    %c0_18 = arith.constant 0 : index
    %c0_19 = arith.constant 0 : index
    %19 = vector.load %arg17[%c0_18, %c0_19] : memref<32x32xf32, #tpu.memory_space<vmem>>, vector<32x32xf32>
    %cst_20 = arith.constant dense<0.000000e+00> : vector<32x32xf32>
    %20 = tpu.matmul %4, %4, %cst_20 {dimension_numbers = #tpu.dot_dimension_numbers<[0], [0], [1], [1], [0, 1, 1, 1], [], []>} : vector<8x32xf32>, vector<8x32xf32>, vector<32x32xf32> -> vector<32x32xf32>
    %21 = arith.addf %19, %20 : vector<32x32xf32>
    %c0_21 = arith.constant 0 : index
    %c0_22 = arith.constant 0 : index
    %22 = vector.load %arg17[%c0_21, %c0_22] : memref<32x32xf32, #tpu.memory_space<vmem>>, vector<32x32xf32>
    tpu.vector_store %arg17[%c0_21, %c0_22], %21 {strides = array<i32>} : memref<32x32xf32, #tpu.memory_space<vmem>>, vector<32x32xf32>,
    %c0_23 = arith.constant 0 : index
    %c0_24 = arith.constant 0 : index
    %23 = vector.load %arg18[%c0_23, %c0_24] : memref<32x32xf32, #tpu.memory_space<vmem>>, vector<32x32xf32>
    %cst_25 = arith.constant dense<0.000000e+00> : vector<32x32xf32>
    %24 = tpu.matmul %3, %4, %cst_25 {dimension_numbers = #tpu.dot_dimension_numbers<[0], [0], [1], [1], [0, 1, 1, 1], [], []>} : vector<8x32xf32>, vector<8x32xf32>, vector<32x32xf32> -> vector<32x32xf32>
    %25 = arith.addf %23, %24 : vector<32x32xf32>
    %c0_26 = arith.constant 0 : index
    %c0_27 = arith.constant 0 : index
    %26 = vector.load %arg18[%c0_26, %c0_27] : memref<32x32xf32, #tpu.memory_space<vmem>>, vector<32x32xf32>
    tpu.vector_store %arg18[%c0_26, %c0_27], %25 {strides = array<i32>} : memref<32x32xf32, #tpu.memory_space<vmem>>, vector<32x32xf32>,
    %c0_i32_28 = arith.constant 0 : i32
    %27 = arith.cmpi eq, %arg0, %c0_i32_28 : i32
    %28 = arith.extui %27 : i1 to i32
    %c0_i32_29 = arith.constant 0 : i32
    %29 = arith.cmpi ne, %28, %c0_i32_29 : i32
    scf.if %29 {
      %c0_30 = arith.constant 0 : index
      %30 = memref.load %arg1[%c0_30] : memref<1xi32, #tpu.memory_space<smem>>
      %c0_i32_31 = arith.constant 0 : i32
      %31 = arith.cmpi ne, %30, %c0_i32_31 : i32
      %cst_32 = arith.constant 9.900000e-01 : f32
      %cst_33 = arith.constant 0.000000e+00 : f32
      %32 = arith.select %31, %cst_32, %cst_33 : f32
      %cst_34 = arith.constant 0.00999999977 : f32
      %cst_35 = arith.constant 1.000000e+00 : f32
      %33 = arith.select %31, %cst_34, %cst_35 : f32
      %cst_36 = arith.constant 1.250000e-01 : f32
      %34 = arith.mulf %33, %cst_36 : f32
      %c0_37 = arith.constant 0 : index
      %c0_38 = arith.constant 0 : index
      %35 = vector.load %arg14[%c0_37, %c0_38] : memref<1x32xf32, #tpu.memory_space<vmem>>, vector<1x32xf32>
      %c0_39 = arith.constant 0 : index
      %c0_40 = arith.constant 0 : index
      %36 = vector.load %arg15[%c0_39, %c0_40] : memref<1x32xf32, #tpu.memory_space<vmem>>, vector<1x32xf32>
      %c0_41 = arith.constant 0 : index
      %c0_42 = arith.constant 0 : index
      %37 = vector.load %arg4[%c0_41, %c0_42] : memref<1x32xf32, #tpu.memory_space<vmem>>, vector<1x32xf32>
      %38 = vector.broadcast %32 : f32 to vector<1x32xf32>
      %39 = arith.mulf %38, %37 : vector<1x32xf32>
      %40 = vector.broadcast %34 : f32 to vector<1x32xf32>
      %41 = arith.mulf %40, %35 : vector<1x32xf32>
      %42 = arith.addf %39, %41 : vector<1x32xf32>
      %c0_43 = arith.constant 0 : index
      %c0_44 = arith.constant 0 : index
      %43 = vector.load %arg5[%c0_43, %c0_44] : memref<1x32xf32, #tpu.memory_space<vmem>>, vector<1x32xf32>
      %44 = vector.broadcast %32 : f32 to vector<1x32xf32>
      %45 = arith.mulf %44, %43 : vector<1x32xf32>
      %46 = vector.broadcast %34 : f32 to vector<1x32xf32>
      %47 = arith.mulf %46, %36 : vector<1x32xf32>
      %48 = arith.addf %45, %47 : vector<1x32xf32>
      %c0_45 = arith.constant 0 : index
      %c0_46 = arith.constant 0 : index
      %49 = vector.load %arg9[%c0_45, %c0_46] : memref<1x32xf32, #tpu.memory_space<vmem>>, vector<1x32xf32>
      tpu.vector_store %arg9[%c0_45, %c0_46], %42 {strides = array<i32>} : memref<1x32xf32, #tpu.memory_space<vmem>>, vector<1x32xf32>,
      %c0_47 = arith.constant 0 : index
      %c0_48 = arith.constant 0 : index
      %50 = vector.load %arg10[%c0_47, %c0_48] : memref<1x32xf32, #tpu.memory_space<vmem>>, vector<1x32xf32>
      tpu.vector_store %arg10[%c0_47, %c0_48], %48 {strides = array<i32>} : memref<1x32xf32, #tpu.memory_space<vmem>>, vector<1x32xf32>,
      %51 = tpu.iota {dimensions = array<i32: 0>} : vector<8x32xi32>
      %cst_49 = arith.constant 0.000000e+00 : f32
      %52 = vector.broadcast %cst_49 : f32 to vector<8x32xf32>
      %cst_50 = arith.constant 0.000000e+00 : f32
      %53 = vector.broadcast %cst_50 : f32 to vector<1x32xf32>
      %54 = arith.subf %53, %35 : vector<1x32xf32>
      %c0_i32_51 = arith.constant 0 : i32
      %55 = vector.broadcast %c0_i32_51 : i32 to vector<8x32xi32>
      %56 = arith.cmpi eq, %51, %55 : vector<8x32xi32>
      %57 = vector.shape_cast %54 : vector<1x32xf32> to vector<1x32xf32>
      %58 = vector.broadcast %57 : vector<1x32xf32> to vector<8x32xf32>
      %59 = arith.select %56, %58, %52 : vector<8x32xi1>, vector<8x32xf32>
      %c1_i32 = arith.constant 1 : i32
      %60 = vector.broadcast %c1_i32 : i32 to vector<8x32xi32>
      %61 = arith.cmpi eq, %51, %60 : vector<8x32xi32>
      %62 = vector.shape_cast %42 : vector<1x32xf32> to vector<1x32xf32>
      %63 = vector.broadcast %62 : vector<1x32xf32> to vector<8x32xf32>
      %64 = arith.select %61, %63, %59 : vector<8x32xi1>, vector<8x32xf32>
      %cst_52 = arith.constant 0.000000e+00 : f32
      %65 = vector.broadcast %cst_52 : f32 to vector<1x32xf32>
      %66 = arith.subf %65, %36 : vector<1x32xf32>
      %c0_i32_53 = arith.constant 0 : i32
      %67 = vector.broadcast %c0_i32_53 : i32 to vector<8x32xi32>
      %68 = arith.cmpi eq, %51, %67 : vector<8x32xi32>
      %69 = vector.shape_cast %66 : vector<1x32xf32> to vector<1x32xf32>
      %70 = vector.broadcast %69 : vector<1x32xf32> to vector<8x32xf32>
      %71 = arith.select %68, %70, %52 : vector<8x32xi1>, vector<8x32xf32>
      %c1_i32_54 = arith.constant 1 : i32
      %72 = vector.broadcast %c1_i32_54 : i32 to vector<8x32xi32>
      %73 = arith.cmpi eq, %51, %72 : vector<8x32xi32>
      %74 = vector.shape_cast %48 : vector<1x32xf32> to vector<1x32xf32>
      %75 = vector.broadcast %74 : vector<1x32xf32> to vector<8x32xf32>
      %76 = arith.select %73, %75, %71 : vector<8x32xi1>, vector<8x32xf32>
      %cst_55 = arith.constant 8.000000e+00 : f32
      %77 = vector.broadcast %cst_55 : f32 to vector<1x32xf32>
      %78 = arith.mulf %77, %42 : vector<1x32xf32>
      %79 = arith.subf %78, %35 : vector<1x32xf32>
      %c0_i32_56 = arith.constant 0 : i32
      %80 = vector.broadcast %c0_i32_56 : i32 to vector<8x32xi32>
      %81 = arith.cmpi eq, %51, %80 : vector<8x32xi32>
      %82 = vector.shape_cast %42 : vector<1x32xf32> to vector<1x32xf32>
      %83 = vector.broadcast %82 : vector<1x32xf32> to vector<8x32xf32>
      %84 = arith.select %81, %83, %52 : vector<8x32xi1>, vector<8x32xf32>
      %c1_i32_57 = arith.constant 1 : i32
      %85 = vector.broadcast %c1_i32_57 : i32 to vector<8x32xi32>
      %86 = arith.cmpi eq, %51, %85 : vector<8x32xi32>
      %87 = vector.shape_cast %79 : vector<1x32xf32> to vector<1x32xf32>
      %88 = vector.broadcast %87 : vector<1x32xf32> to vector<8x32xf32>
      %89 = arith.select %86, %88, %84 : vector<8x32xi1>, vector<8x32xf32>
      %cst_58 = arith.constant 8.000000e+00 : f32
      %90 = vector.broadcast %cst_58 : f32 to vector<1x32xf32>
      %91 = arith.mulf %90, %48 : vector<1x32xf32>
      %92 = arith.subf %91, %36 : vector<1x32xf32>
      %c0_i32_59 = arith.constant 0 : i32
      %93 = vector.broadcast %c0_i32_59 : i32 to vector<8x32xi32>
      %94 = arith.cmpi eq, %51, %93 : vector<8x32xi32>
      %95 = vector.shape_cast %48 : vector<1x32xf32> to vector<1x32xf32>
      %96 = vector.broadcast %95 : vector<1x32xf32> to vector<8x32xf32>
      %97 = arith.select %94, %96, %52 : vector<8x32xi1>, vector<8x32xf32>
      %c1_i32_60 = arith.constant 1 : i32
      %98 = vector.broadcast %c1_i32_60 : i32 to vector<8x32xi32>
      %99 = arith.cmpi eq, %51, %98 : vector<8x32xi32>
      %100 = vector.shape_cast %92 : vector<1x32xf32> to vector<1x32xf32>
      %101 = vector.broadcast %100 : vector<1x32xf32> to vector<8x32xf32>
      %102 = arith.select %99, %101, %97 : vector<8x32xi1>, vector<8x32xf32>
      %c0_61 = arith.constant 0 : index
      %c0_62 = arith.constant 0 : index
      %103 = vector.load %arg16[%c0_61, %c0_62] : memref<32x32xf32, #tpu.memory_space<vmem>>, vector<32x32xf32>
      %cst_63 = arith.constant dense<0.000000e+00> : vector<32x32xf32>
      %104 = tpu.matmul %64, %89, %cst_63 {dimension_numbers = #tpu.dot_dimension_numbers<[0], [0], [1], [1], [0, 1, 1, 1], [], []>} : vector<8x32xf32>, vector<8x32xf32>, vector<32x32xf32> -> vector<32x32xf32>
      %105 = arith.addf %103, %104 : vector<32x32xf32>
      %c0_64 = arith.constant 0 : index
      %c0_65 = arith.constant 0 : index
      %106 = vector.load %arg17[%c0_64, %c0_65] : memref<32x32xf32, #tpu.memory_space<vmem>>, vector<32x32xf32>
      %cst_66 = arith.constant dense<0.000000e+00> : vector<32x32xf32>
      %107 = tpu.matmul %76, %102, %cst_66 {dimension_numbers = #tpu.dot_dimension_numbers<[0], [0], [1], [1], [0, 1, 1, 1], [], []>} : vector<8x32xf32>, vector<8x32xf32>, vector<32x32xf32> -> vector<32x32xf32>
      %108 = arith.addf %106, %107 : vector<32x32xf32>
      %c0_67 = arith.constant 0 : index
      %c0_68 = arith.constant 0 : index
      %109 = vector.load %arg18[%c0_67, %c0_68] : memref<32x32xf32, #tpu.memory_space<vmem>>, vector<32x32xf32>
      %cst_69 = arith.constant dense<0.000000e+00> : vector<32x32xf32>
      %110 = tpu.matmul %64, %102, %cst_69 {dimension_numbers = #tpu.dot_dimension_numbers<[0], [0], [1], [1], [0, 1, 1, 1], [], []>} : vector<8x32xf32>, vector<8x32xf32>, vector<32x32xf32> -> vector<32x32xf32>
      %111 = arith.addf %109, %110 : vector<32x32xf32>
      %c0_70 = arith.constant 0 : index
      %c0_71 = arith.constant 0 : index
      %112 = vector.load %arg6[%c0_70, %c0_71] : memref<32x32xf32, #tpu.memory_space<vmem>>, vector<32x32xf32>
      %113 = vector.broadcast %32 : f32 to vector<32x32xf32>
      %114 = arith.mulf %113, %112 : vector<32x32xf32>
      %115 = vector.broadcast %34 : f32 to vector<32x32xf32>
      %116 = arith.mulf %115, %105 : vector<32x32xf32>
      %117 = arith.addf %114, %116 : vector<32x32xf32>
      %c0_72 = arith.constant 0 : index
      %c0_73 = arith.constant 0 : index
      %118 = vector.load %arg11[%c0_72, %c0_73] : memref<32x32xf32, #tpu.memory_space<vmem>>, vector<32x32xf32>
      tpu.vector_store %arg11[%c0_72, %c0_73], %117 {strides = array<i32>} : memref<32x32xf32, #tpu.memory_space<vmem>>, vector<32x32xf32>,
      %c0_74 = arith.constant 0 : index
      %c0_75 = arith.constant 0 : index
      %119 = vector.load %arg7[%c0_74, %c0_75] : memref<32x32xf32, #tpu.memory_space<vmem>>, vector<32x32xf32>
      %120 = vector.broadcast %32 : f32 to vector<32x32xf32>
      %121 = arith.mulf %120, %119 : vector<32x32xf32>
      %122 = vector.broadcast %34 : f32 to vector<32x32xf32>
      %123 = arith.mulf %122, %108 : vector<32x32xf32>
      %124 = arith.addf %121, %123 : vector<32x32xf32>
      %c0_76 = arith.constant 0 : index
      %c0_77 = arith.constant 0 : index
      %125 = vector.load %arg12[%c0_76, %c0_77] : memref<32x32xf32, #tpu.memory_space<vmem>>, vector<32x32xf32>
      tpu.vector_store %arg12[%c0_76, %c0_77], %124 {strides = array<i32>} : memref<32x32xf32, #tpu.memory_space<vmem>>, vector<32x32xf32>,
      %c0_78 = arith.constant 0 : index
      %c0_79 = arith.constant 0 : index
      %126 = vector.load %arg8[%c0_78, %c0_79] : memref<32x32xf32, #tpu.memory_space<vmem>>, vector<32x32xf32>
      %127 = vector.broadcast %32 : f32 to vector<32x32xf32>
      %128 = arith.mulf %127, %126 : vector<32x32xf32>
      %129 = vector.broadcast %34 : f32 to vector<32x32xf32>
      %130 = arith.mulf %129, %111 : vector<32x32xf32>
      %131 = arith.addf %128, %130 : vector<32x32xf32>
      %c0_80 = arith.constant 0 : index
      %c0_81 = arith.constant 0 : index
      %132 = vector.load %arg13[%c0_80, %c0_81] : memref<32x32xf32, #tpu.memory_space<vmem>>, vector<32x32xf32>
      tpu.vector_store %arg13[%c0_80, %c0_81], %131 {strides = array<i32>} : memref<32x32xf32, #tpu.memory_space<vmem>>, vector<32x32xf32>,
    } else {
    }
    return
  }
  func.func @transform_0(%arg0: i32, %arg1: memref<1xi32, #tpu.memory_space<smem>>) -> (i32, i32) {
    %c0_i32 = arith.constant 0 : i32
    %c0_i32_0 = arith.constant 0 : i32
    return %arg0, %c0_i32 : i32, i32
  }
  func.func @transform_1(%arg0: i32, %arg1: memref<1xi32, #tpu.memory_space<smem>>) -> (i32, i32) {
    %c0_i32 = arith.constant 0 : i32
    %c0_i32_0 = arith.constant 0 : i32
    return %arg0, %c0_i32 : i32, i32
  }
  func.func @transform_2(%arg0: i32, %arg1: memref<1xi32, #tpu.memory_space<smem>>) -> (i32, i32) {
    %c0_i32 = arith.constant 0 : i32
    %c0_i32_0 = arith.constant 0 : i32
    %c0_i32_1 = arith.constant 0 : i32
    return %c0_i32, %c0_i32_0 : i32, i32
  }
  func.func @transform_3(%arg0: i32, %arg1: memref<1xi32, #tpu.memory_space<smem>>) -> (i32, i32) {
    %c0_i32 = arith.constant 0 : i32
    %c0_i32_0 = arith.constant 0 : i32
    %c0_i32_1 = arith.constant 0 : i32
    return %c0_i32, %c0_i32_0 : i32, i32
  }
  func.func @transform_4(%arg0: i32, %arg1: memref<1xi32, #tpu.memory_space<smem>>) -> (i32, i32) {
    %c0_i32 = arith.constant 0 : i32
    %c0_i32_0 = arith.constant 0 : i32
    %c0_i32_1 = arith.constant 0 : i32
    return %c0_i32, %c0_i32_0 : i32, i32
  }
  func.func @transform_5(%arg0: i32, %arg1: memref<1xi32, #tpu.memory_space<smem>>) -> (i32, i32) {
    %c0_i32 = arith.constant 0 : i32
    %c0_i32_0 = arith.constant 0 : i32
    %c0_i32_1 = arith.constant 0 : i32
    return %c0_i32, %c0_i32_0 : i32, i32
  }
  func.func @transform_6(%arg0: i32, %arg1: memref<1xi32, #tpu.memory_space<smem>>) -> (i32, i32) {
    %c0_i32 = arith.constant 0 : i32
    %c0_i32_0 = arith.constant 0 : i32
    %c0_i32_1 = arith.constant 0 : i32
    return %c0_i32, %c0_i32_0 : i32, i32
  }
  func.func @transform_7(%arg0: i32, %arg1: memref<1xi32, #tpu.memory_space<smem>>) -> (i32, i32) {
    %c0_i32 = arith.constant 0 : i32
    %c0_i32_0 = arith.constant 0 : i32
    %c0_i32_1 = arith.constant 0 : i32
    return %c0_i32, %c0_i32_0 : i32, i32
  }
  func.func @transform_8(%arg0: i32, %arg1: memref<1xi32, #tpu.memory_space<smem>>) -> (i32, i32) {
    %c0_i32 = arith.constant 0 : i32
    %c0_i32_0 = arith.constant 0 : i32
    %c0_i32_1 = arith.constant 0 : i32
    return %c0_i32, %c0_i32_0 : i32, i32
  }
  func.func @transform_9(%arg0: i32, %arg1: memref<1xi32, #tpu.memory_space<smem>>) -> (i32, i32) {
    %c0_i32 = arith.constant 0 : i32
    %c0_i32_0 = arith.constant 0 : i32
    %c0_i32_1 = arith.constant 0 : i32
    return %c0_i32, %c0_i32_0 : i32, i32
  }
  func.func @transform_10(%arg0: i32, %arg1: memref<1xi32, #tpu.memory_space<smem>>) -> (i32, i32) {
    %c0_i32 = arith.constant 0 : i32
    %c0_i32_0 = arith.constant 0 : i32
    %c0_i32_1 = arith.constant 0 : i32
    return %c0_i32, %c0_i32_0 : i32, i32
  }
  func.func @transform_11(%arg0: i32, %arg1: memref<1xi32, #tpu.memory_space<smem>>) -> (i32, i32) {
    %c0_i32 = arith.constant 0 : i32
    %c0_i32_0 = arith.constant 0 : i32
    %c0_i32_1 = arith.constant 0 : i32
    return %c0_i32, %c0_i32_0 : i32, i32
  }
}

</mosaic_0001>

<bundles_post_ra>
// kernel: tpu_custom_call.1
= control target key start
LH: loop header
LB: loop body
LE: loop exit
PB: predicated region body
PF: predicated region fallthrough
CT: control target
= control target key end

     0   :  { %19 = vsyncpa [#allocation10], 0  ;;  %s1682_s0 = inlined_call_operand.<no memory space> [shape: s32[1], index: 0, kind: input, shape index: {}]   ;;  %s1683_s1 = inlined_call_operand.vmem [shape: f32[8,32], index: 1, kind: input, shape index: {}]   ;;  %s1684_s2 = inlined_call_operand.vmem [shape: f32[8,32], index: 2, kind: input, shape index: {}]   ;;  %s1685_s3 = inlined_call_operand.hbm [shape: f32[1,32], index: 3, kind: input, shape index: {}, may-alias: {3,8}]   ;;  %s1686_s4 = inlined_call_operand.hbm [shape: f32[1,32], index: 4, kind: input, shape index: {}, may-alias: {4,9}]   ;;  %s1687_s5 = inlined_call_operand.hbm [shape: f32[32,32], index: 5, kind: input, shape index: {}, may-alias: {5,10}]   ;;  %s1688_s6 = inlined_call_operand.hbm [shape: f32[32,32], index: 6, kind: input, shape index: {}, may-alias: {6,11}]   ;;  %s1689_s7 = inlined_call_operand.hbm [shape: f32[32,32], index: 7, kind: input, shape index: {}, may-alias: {7,12}]   ;;  %s1690_s8 = inlined_call_operand.hbm [shape: f32[1,32], index: 8, kind: output, shape index: {0}, may-alias: {3,8}]   ;;  %s1691_s9 = inlined_call_operand.hbm [shape: f32[1,32], index: 9, kind: output, shape index: {1}, may-alias: {4,9}]   ;;  %s1692_s10 = inlined_call_operand.hbm [shape: f32[32,32], index: 10, kind: output, shape index: {2}, may-alias: {5,10}]   ;;  %s1693_s11 = inlined_call_operand.hbm [shape: f32[32,32], index: 11, kind: output, shape index: {3}, may-alias: {6,11}]   ;;  %s1694_s12 = inlined_call_operand.hbm [shape: f32[32,32], index: 12, kind: output, shape index: {4}, may-alias: {7,12}]  }
   0x1   :  { %20 = vsyncpa [#allocation13], 0 }
   0x2   :  { %21 = vsyncpa [#allocation16], 0 }
   0x3   :  { %22 = vsyncpa [#allocation11], 0 }
   0x4   :  { %23 = vsyncpa [#allocation20], 0 }
   0x5   :  { %24 = vsyncpa [#allocation23], 0  ;;  %s1431_s21 = smov [#allocation12]  }
   0x6   :  { %s45_s22 = sshll.u32 %s1431_s21, 4  ;;  %s46_s22 = int_to_ptr.vmem [resolvable:$true] %s45_s22 }
   0x7   :  { %s1227_s23 = scalar_lea.vmem %s46_s22, 16  ;;  %s1231_s24 = scalar_lea.vmem %s46_s22, 32 }
   0x8   :  { %p1228_p0 = scmp.ne.s32.totalorder %s46_s22, %s1227_s23  ;;  %p1232_p1 = scmp.lt.s32.totalorder %s46_s22, %s46_s22 }
   0x9   :  { %p1233_p2 = scmp.lt.s32.totalorder %s1231_s24, %s1227_s23 }
   0xb   :  { %p1234_p3 = por %p1233_p2, %p1232_p1 }
   0xd   :  { %p1235_p4 = pnand %p1234_p3, %p1228_p0 }
   0xf   :  { %1238 = shalt.err (!%p1235_p4)
}
  0x10   :  { %48 = dma.hbm_to_vmem [thread:$0]  %s1686_s4, 16, %s46_s22, [#allocation13]  }
  0x11   :  { %s1432_s27 = smov [#allocation15]   ;;  %s1433_s29 = smov [#allocation9]  }
  0x12   :  { %s66_s28 = sshll.u32 %s1432_s27, 4  ;;  %s35_s30 = sshll.u32 %s1433_s29, 4  ;;  %s67_s28 = int_to_ptr.vmem [resolvable:$true] %s66_s28  ;;  %s36_s30 = int_to_ptr.vmem [resolvable:$true] %s35_s30 }
  0x13   :  { %s1247_s13 = scalar_lea.vmem %s67_s28, 512  ;;  %p1252_p6 = scmp.lt.s32.totalorder %s67_s28, %s67_s28 }
  0x14   :  { %p1248_p5 = scmp.ne.s32.totalorder %s67_s28, %s1247_s13  ;;  %p1253_p7 = scmp.lt.s32.totalorder %s1247_s13, %s1247_s13 }
  0x16   :  { %p1254_p8 = por %p1253_p7, %p1252_p6 }
  0x18   :  { %p1255_p9 = pnand %p1254_p8, %p1248_p5 }
  0x1a   :  { %1258 = shalt.err (!%p1255_p9)
}
  0x1b   :  { %s1434_s14 = smov 128   ;;  %s1435_s15 = smov 8  }
  0x1c   :  { %72 = dma.hbm_to_vmem [thread:$0]  %s1688_s6, 512, %s67_s28, [#allocation16], %s1434_s14, %s1434_s14, %s1435_s15  }
  0x1d   :  { %s1267_s4 = scalar_lea.vmem %s36_s30, 16  ;;  %s1271_s18 = scalar_lea.vmem %s36_s30, 32 }
  0x1e   :  { %p1268_p10 = scmp.ne.s32.totalorder %s36_s30, %s1267_s4  ;;  %p1272_p11 = scmp.lt.s32.totalorder %s36_s30, %s36_s30 }
  0x1f   :  { %p1273_p12 = scmp.lt.s32.totalorder %s1271_s18, %s1267_s4 }
  0x21   :  { %p1274_p13 = por %p1273_p12, %p1272_p11 }
  0x23   :  { %p1275_p0 = pnand %p1274_p13, %p1268_p10 }
  0x25   :  { %1278 = shalt.err (!%p1275_p0)
}
  0x26   :  { %38 = dma.hbm_to_vmem [thread:$0]  %s1685_s3, 16, %s36_s30, [#allocation10]  }
  0x27   :  { %s1436_s21 = smov [#allocation14]   ;;  %s1437_s23 = smov [#allocation17]  }
  0x28   :  { %s54_s22 = sshll.u32 %s1436_s21, 4  ;;  %s78_s24 = sshll.u32 %s1437_s23, 4  ;;  %s55_s22 = int_to_ptr.vmem [resolvable:$true] %s54_s22  ;;  %s79_s24 = int_to_ptr.vmem [resolvable:$true] %s78_s24 }
  0x29   :  { %s1287_s25 = scalar_lea.vmem %s55_s22, 512  ;;  %p1292_p2 = scmp.lt.s32.totalorder %s55_s22, %s55_s22 }
  0x2a   :  { %p1288_p1 = scmp.ne.s32.totalorder %s55_s22, %s1287_s25  ;;  %p1293_p3 = scmp.lt.s32.totalorder %s1287_s25, %s1287_s25 }
  0x2c   :  { %p1294_p4 = por %p1293_p3, %p1292_p2 }
  0x2e   :  { %p1295_p5 = pnand %p1294_p4, %p1288_p1 }
  0x30   :  { %1298 = shalt.err (!%p1295_p5)
}
  0x31   :  { %60 = dma.hbm_to_vmem [thread:$0]  %s1687_s5, 512, %s55_s22, [#allocation13], %s1434_s14, %s1434_s14, %s1435_s15  }
  0x32   :  { %s1307_s3 = scalar_lea.vmem %s79_s24, 512  ;;  %p1312_p7 = scmp.lt.s32.totalorder %s79_s24, %s79_s24 }
  0x33   :  { %p1308_p6 = scmp.ne.s32.totalorder %s79_s24, %s1307_s3  ;;  %p1313_p8 = scmp.lt.s32.totalorder %s1307_s3, %s1307_s3 }
  0x35   :  { %p1314_p9 = por %p1313_p8, %p1312_p7 }
  0x37   :  { %p1315_p10 = pnand %p1314_p9, %p1308_p6 }
  0x39   :  { %1318 = shalt.err (!%p1315_p10)
}
  0x3a   :  { %84 = dma.hbm_to_vmem [thread:$0]  %s1689_s7, 512, %s79_s24, [#allocation16], %s1434_s14, %s1434_s14, %s1435_s15  }
  0x3b   :  { %1419 = dma.done.wait [#allocation10], 16  }
  0x3c   :  { %1420 = vsyncadd [#allocation10], 4294967280 }
  0x3d   :  { %1421 = dma.done.wait [#allocation13], 528  }
  0x3e   :  { %1422 = vsyncadd [#allocation13], 4294966768 }
  0x3f   :  { %1423 = dma.done.wait [#allocation16], 1024  }
  0x40   :  { %1424 = vsyncadd [#allocation16], 4294966272  ;;  %vm104_vm0 = vcmask 253952   ;;  %vm107_vm1 = vcmask 261120   ;;  %v1438_v0 = vmov 0.0   ;;  %v120_v1 = vld [vmem:[%s1683_s1] sm:$0xff]  ;;  %v546_v21 = vlaneseq }
  0x41   :  { %105 = vst.msk [vmem:[#allocation2] sm:$0x1] %vm104_vm0, %v1438_v0  ;;  %106 = vst.msk [vmem:[#allocation3] sm:$0x1] %vm104_vm0, %v1438_v0  ;;  %v1553_v2 = vld [vmem:[%s1684_s2] sm:$0xff]  ;;  %148 = vxpose.xlu0.b32.start.end [1/1] (short) (narrow) %v120_v1, 32  ;;  %1158 = vmatprep.subr.mxu0 %v120_v1 }
  0x42   :  { %108 = vst.msk [vmem:[#allocation4] sm:$0xff] %vm107_vm1, %v1438_v0  ;;  %109 = vst.msk [vmem:[#allocation4 + $0x8] sm:$0xff] %vm107_vm1, %v1438_v0  ;;  %v124_v3 = vsel %vm107_vm1, %v120_v1, 0.0  ;;  %v135_v4 = vsel %vm107_vm1, %v1553_v2, 0.0  ;;  %1159 = vmatpush3.msra.mxu0 %v120_v1  ;;  %1166 = vmatprep.subr.mxu1 %v1553_v2  ;;  %p528_p11 = scmp.ne.s32.totalorder %s1682_s0, 0  ;;  %v547_v22 = vshrl.u32 %v546_v21, 7 }
  0x43   :  { %110 = vst.msk [vmem:[#allocation4 + $0x10] sm:$0xff] %vm107_vm1, %v1438_v0  ;;  %111 = vst.msk [vmem:[#allocation4 + $0x18] sm:$0xff] %vm107_vm1, %v1438_v0  ;;  %v125_v5 = vrot.slane %v124_v3, 4  ;;  %v136_v6 = vrot.slane %v135_v4, 4  ;;  %1174 = vmatprep.subr.mxu0 %v1553_v2  ;;  %1167 = vmatpush3.msra.mxu1 %v1553_v2  ;;  %v534_v23 = vld [vmem:[#allocation9] sm:$0x1] }
  0x44   :  { %112 = vst.msk [vmem:[#allocation5] sm:$0xff] %vm107_vm1, %v1438_v0  ;;  %113 = vst.msk [vmem:[#allocation5 + $0x8] sm:$0xff] %vm107_vm1, %v1438_v0  ;;  %s530_s13 = scalar_select %p528_p11, 0.01, 1.0  ;;  %v553_v28 = vsub.s32 0, %v547_v22 }
  0x45   :  { %114 = vst.msk [vmem:[#allocation5 + $0x10] sm:$0xff] %vm107_vm1, %v1438_v0  ;;  %115 = vst.msk [vmem:[#allocation5 + $0x18] sm:$0xff] %vm107_vm1, %v1438_v0  ;;  %v126_v7 = vadd.f32 %v125_v5, %v124_v3  ;;  %v137_v8 = vadd.f32 %v136_v6, %v135_v4  ;;  %s529_s16 = scalar_select %p528_p11, 0.99, 0.0  ;;  %vm549_vm2 = vcmp.eq.s32.totalorder %v547_v22, 0 }
  0x46   :  { %116 = vst.msk [vmem:[#allocation6] sm:$0xff] %vm107_vm1, %v1438_v0  ;;  %117 = vst.msk [vmem:[#allocation6 + $0x8] sm:$0xff] %vm107_vm1, %v1438_v0  ;;  %s531_s17 = smul.f32 0.125, %s530_s13  ;;  %v540_v25 = vld [vmem:[#allocation12] sm:$0x1]  ;;  %vm557_vm3 = vcmp.eq.s32.totalorder %v547_v22, 1 }
  0x47   :  { %118 = vst.msk [vmem:[#allocation6 + $0x10] sm:$0xff] %vm107_vm1, %v1438_v0  ;;  %119 = vst.msk [vmem:[#allocation6 + $0x18] sm:$0xff] %vm107_vm1, %v1438_v0  ;;  %v127_v9 = vrot.slane %v126_v7, 2  ;;  %v138_v10 = vrot.slane %v137_v8, 2  ;;  %v1567_v24 = vstv %s529_s16  ;;  %vm180_vm4 = vcmask 64512   ;;  %s1439_s0 = smov [#allocation19]  }
  0x48   :  { %v122_v15 = vld [vmem:[#allocation2] sm:$0x1]  ;;  %v134_v16 = vld [vmem:[#allocation3] sm:$0x1]  ;;  %v1569_v26 = vstv %s531_s17  ;;  %v536_v27 = vmul.f32 %v1567_v24, %v534_v23  ;;  %v541_v29 = vmul.f32 %v540_v25, %v1567_v24  ;;  %s1043_s4 = sshll.u32 %s1439_s0, 4  ;;  %s1044_s4 = int_to_ptr.vmem [resolvable:$true] %s1043_s4 }
  0x49   :  { %v128_v11 = vadd.f32 %v127_v9, %v126_v7  ;;  %v139_v12 = vadd.f32 %v138_v10, %v137_v8  ;;  %s1319_s18 = scalar_lea.vmem %s1044_s4, 16  ;;  %s1323_s19 = scalar_lea.vmem %s1044_s4, 32 }
  0x4a   :  { %p1320_p12 = scmp.ne.s32.totalorder %s1044_s4, %s1319_s18  ;;  %p1324_p13 = scmp.lt.s32.totalorder %s1044_s4, %s1044_s4 }
  0x4b   :  { %v129_v13 = vrot.slane %v128_v11, 1  ;;  %v140_v14 = vrot.slane %v139_v12, 1  ;;  %p1325_p0 = scmp.lt.s32.totalorder %s1323_s19, %s1319_s18 }
  0x4d   :  { %v130_v17 = vadd.f32 %v129_v13, %v128_v11  ;;  %v141_v18 = vadd.f32 %v140_v14, %v139_v12  ;;  %p1326_p1 = por %p1325_p0, %p1324_p13 }
  0x4e   :  { %290 = vxpose.xlu0.b32.start.end [1/1] (short) (narrow) %v1553_v2, 32 }
  0x4f   :  { %v131_v19 = vadd.f32 %v130_v17, %v122_v15  ;;  %v142_v20 = vadd.f32 %v141_v18, %v134_v16  ;;  %p1327_p2 = pnand %p1326_p1, %p1320_p12 }
  0x51   :  { %133 = vst.msk [vmem:[#allocation2] sm:$0x1] %vm104_vm0, %v131_v19  ;;  %143 = vst.msk [vmem:[#allocation3] sm:$0x1] %vm104_vm0, %v142_v20 }
  0x58   :  { %v532_v30 = vld [vmem:[#allocation2] sm:$0x1]  ;;  %v533_v31 = vld [vmem:[#allocation3] sm:$0x1] }
  0x59   :  { %v538_v32 = vmul.f32 %v1569_v26, %v532_v30  ;;  %v548_v33 = vsub.f32 0.0, %v532_v30  ;;  %v542_v34 = vmul.f32 %v1569_v26, %v533_v31  ;;  %v565_v42 = vsub.f32 0.0, %v533_v31 }
  0x5b   :  { %v539_v35 = vadd.f32 %v538_v32, %v536_v27  ;;  %v554_v36 = vrot.slane %v548_v33, %v553_v28  ;;  %v543_v37 = vadd.f32 %v542_v34, %v541_v29  ;;  %v570_v46 = vrot.slane %v565_v42, %v553_v28 }
  0x5d   :  { %v556_v38 = vsel %vm549_vm2, %v554_v36, 0.0  ;;  %v562_v39 = vrot.slane %v539_v35, %v553_v28  ;;  %544 = vst.msk [vmem:[#allocation18] sm:$0x1] %vm104_vm0, %v539_v35  ;;  %545 = vst.msk [vmem:[#allocation19] sm:$0x1] %vm104_vm0, %v543_v37  ;;  %v580_v40 = vmul.f32 8.0, %v539_v35  ;;  %v577_v49 = vrot.slane %v543_v37, %v553_v28 }
  0x5e   :  { %v590_v48 = vmul.f32 8.0, %v543_v37  ;;  %v572_v51 = vsel %vm549_vm2, %v570_v46, 0.0 }
  0x5f   :  { %v564_v41 = vsel %vm557_vm3, %v562_v39, %v556_v38  ;;  %v581_v43 = vsub.f32 %v580_v40, %v532_v30  ;;  %v582_v44 = vsel %vm549_vm2, %v562_v39, 0.0  ;;  %v592_v53 = vsel %vm549_vm2, %v577_v49, 0.0 }
  0x60   :  { %604 = vxpose.xlu1.b32.start.end [1/1] (short) (narrow) %v564_v41, 32  ;;  %v591_v50 = vsub.f32 %v590_v48, %v533_v31  ;;  %v579_v54 = vsel %vm557_vm3, %v577_v49, %v572_v51 }
  0x61   :  { %v587_v45 = vrot.slane %v581_v43, %v553_v28 }
  0x62   :  { %v597_v52 = vrot.slane %v591_v50, %v553_v28 }
  0x63   :  { %v589_v47 = vsel %vm557_vm3, %v587_v45, %v582_v44 }
  0x64   :  { %1182 = vmatprep.subr.mxu1 %v589_v47  ;;  %v599_v55 = vsel %vm557_vm3, %v597_v52, %v592_v53 }
  0x6d   :  { %741 = vxpose.xlu1.b32.start.end [1/1] (short) (narrow) %v579_v54, 32 }
  0xbd   :  { %v164_v56 = vpop.trf.xlu0 }
  0xbe   :  { %1160 = vmatprep.mubr.msk.f32.mxu0 %vm180_vm4, %v164_v56 }
  0xc1   :  { %v165_v57 = vpop.trf.xlu0 }
  0xc2   :  { %1161 = vmatmul.mubr.msk.f32.vlgmr.msra.gmra.mxu0 %vm180_vm4, %v165_v57 }
  0xc3   :  { %1175 = vmatpush3.msra.mxu0 %v1553_v2 }
  0xc4   :  { %1190 = vmatprep.subr.mxu0 %v599_v55 }
  0xc5   :  { %v166_v58 = vpop.trf.xlu0 }
  0xc6   :  { %1163 = vmatprep.mubr.msk.f32.mxu0 %vm180_vm4, %v166_v58 }
  0xc9   :  { %v167_v59 = vpop.trf.xlu0 }
  0xca   :  { %1164 = vmatmul.mubr.msk.f32.gmra.mxu0 %vm180_vm4, %v167_v59 }
  0xcb   :  { %1176 = vmatprep.mubr.msk.f32.mxu0 %vm180_vm4, %v164_v56 }
  0xcd   :  { %v306_v60 = vpop.trf.xlu0 }
  0xce   :  { %1177 = vmatmul.mubr.msk.f32.vlgmr.msra.gmra.mxu0 %vm180_vm4, %v165_v57  ;;  %1168 = vmatprep.mubr.msk.f32.mxu1 %vm180_vm4, %v306_v60 }
  0xcf   :  { %1179 = vmatprep.mubr.msk.f32.mxu0 %vm180_vm4, %v166_v58  ;;  %1191 = vmatpush3.msra.mxu0 %v599_v55 }
  0xd1   :  { %v307_v61 = vpop.trf.xlu0 }
  0xd2   :  { %1169 = vmatmul.mubr.msk.f32.vlgmr.msra.gmra.mxu1 %vm180_vm4, %v307_v61  ;;  %1180 = vmatmul.mubr.msk.f32.gmra.mxu0 %vm180_vm4, %v167_v59 }
  0xd3   :  { %1183 = vmatpush3.msra.mxu1 %v589_v47 }
  0xd4   :  { %1198 = vmatprep.subr.mxu1 %v599_v55 }
  0xd5   :  { %v308_v62 = vpop.trf.xlu0 }
  0xd6   :  { %1171 = vmatprep.mubr.msk.f32.mxu1 %vm180_vm4, %v308_v62 }
  0xd9   :  { %v309_v63 = vpop.trf.xlu0 }
  0xda   :  { %1172 = vmatmul.mubr.msk.f32.gmra.mxu1 %vm180_vm4, %v309_v63 }
  0xdc   :  { %v620_v0 = vpop.trf.xlu1 }
  0xdd   :  { %1184 = vmatprep.mubr.msk.f32.mxu1 %vm180_vm4, %v620_v0 }
  0xe0   :  { %v621_v1 = vpop.trf.xlu1 }
  0xe1   :  { %1185 = vmatmul.mubr.msk.f32.vlgmr.msra.gmra.mxu1 %vm180_vm4, %v621_v1 }
  0xe2   :  { %1199 = vmatpush3.msra.mxu1 %v599_v55 }
  0xe4   :  { %v622_v2 = vpop.trf.xlu1 }
  0xe5   :  { %1187 = vmatprep.mubr.msk.f32.mxu1 %vm180_vm4, %v622_v2 }
  0xe8   :  { %v623_v3 = vpop.trf.xlu1 }
  0xe9   :  { %1188 = vmatmul.mubr.msk.f32.gmra.mxu1 %vm180_vm4, %v623_v3 }
  0xea   :  { %1200 = vmatprep.mubr.msk.f32.mxu1 %vm180_vm4, %v620_v0 }
  0xec   :  { %v757_v4 = vpop.trf.xlu1 }
  0xed   :  { %1192 = vmatprep.mubr.msk.f32.mxu0 %vm180_vm4, %v757_v4  ;;  %1201 = vmatmul.mubr.msk.f32.vlgmr.msra.gmra.mxu1 %vm180_vm4, %v621_v1 }
  0xee   :  { %1203 = vmatprep.mubr.msk.f32.mxu1 %vm180_vm4, %v622_v2 }
  0xf0   :  { %v758_v5 = vpop.trf.xlu1 }
  0xf1   :  { %1193 = vmatmul.mubr.msk.f32.vlgmr.msra.gmra.mxu0 %vm180_vm4, %v758_v5  ;;  %1204 = vmatmul.mubr.msk.f32.gmra.mxu1 %vm180_vm4, %v623_v3 }
  0xf4   :  { %v759_v6 = vpop.trf.xlu1 }
  0xf5   :  { %1195 = vmatprep.mubr.msk.f32.mxu0 %vm180_vm4, %v759_v6 }
  0xf8   :  { %v760_v7 = vpop.trf.xlu1 }
  0xf9   :  { %1196 = vmatmul.mubr.msk.f32.gmra.mxu0 %vm180_vm4, %v760_v7 }
  0xfa   :  { %1330 = shalt.err (!%p1327_p2)
}
  0xfb   :  { %1046 = dma.vmem_to_hbm [thread:$0]  %s1044_s4, 16, %s1691_s9, [#allocation20]  }
  0xfc   :  { %s1440_s22 = smov [#allocation18]  }
  0xfd   :  { %s1033_s23 = sshll.u32 %s1440_s22, 4  ;;  %s1034_s23 = int_to_ptr.vmem [resolvable:$true] %s1033_s23 }
  0xfe   :  { %s1339_s24 = scalar_lea.vmem %s1034_s23, 16  ;;  %s1343_s25 = scalar_lea.vmem %s1034_s23, 32 }
  0xff   :  { %p1340_p3 = scmp.ne.s32.totalorder %s1034_s23, %s1339_s24  ;;  %p1344_p4 = scmp.lt.s32.totalorder %s1034_s23, %s1034_s23 }
 0x100   :  { %p1345_p5 = scmp.lt.s32.totalorder %s1343_s25, %s1339_s24 }
 0x102   :  { %p1346_p6 = por %p1345_p5, %p1344_p4 }
 0x104   :  { %p1347_p7 = pnand %p1346_p6, %p1340_p3 }
 0x106   :  { %1350 = shalt.err (!%p1347_p7)
}
 0x107   :  { %1036 = dma.vmem_to_hbm [thread:$0]  %s1034_s23, 16, %s1690_s8, [#allocation11]   ;;  %v145_v8 = vld [vmem:[#allocation4 + $0x8] sm:$0xff]  ;;  %v144_v10 = vld [vmem:[#allocation4] sm:$0xff]  ;;  %v147_v14 = vld [vmem:[#allocation4 + $0x18] sm:$0xff] }
 0x108   :  { %v146_v16 = vld [vmem:[#allocation4 + $0x10] sm:$0xff]  ;;  %v428_v19 = vld [vmem:[#allocation6 + $0x8] sm:$0xff]  ;;  %v427_v22 = vld [vmem:[#allocation6] sm:$0xff]  ;;  %s1441_s8 = smov [#allocation21]  }
 0x109   :  { %v430_v27 = vld [vmem:[#allocation6 + $0x18] sm:$0xff]  ;;  %v287_v28 = vld [vmem:[#allocation5 + $0x8] sm:$0xff]  ;;  %v429_v32 = vld [vmem:[#allocation6 + $0x10] sm:$0xff]  ;;  %s1052_s9 = sshll.u32 %s1441_s8, 4  ;;  %s1053_s9 = int_to_ptr.vmem [resolvable:$true] %s1052_s9 }
 0x10a   :  { %v286_v33 = vld [vmem:[#allocation5] sm:$0xff]  ;;  %v289_v40 = vld [vmem:[#allocation5 + $0x18] sm:$0xff]  ;;  %v288_v42 = vld [vmem:[#allocation5 + $0x10] sm:$0xff]  ;;  %s1359_s3 = scalar_lea.vmem %s1053_s9, 512  ;;  %p1364_p9 = scmp.lt.s32.totalorder %s1053_s9, %s1053_s9 }
 0x10b   :  { %v968_v46 = vld [vmem:[#allocation14 + $0x8] sm:$0xff]  ;;  %v967_v49 = vld [vmem:[#allocation14] sm:$0xff]  ;;  %v970_v59 = vld [vmem:[#allocation14 + $0x18] sm:$0xff]  ;;  %p1360_p8 = scmp.ne.s32.totalorder %s1053_s9, %s1359_s3  ;;  %p1365_p10 = scmp.lt.s32.totalorder %s1359_s3, %s1359_s3 }
 0x10c   :  { %v972_v51 = vmul.f32 %v968_v46, %v1567_v24  ;;  %v971_v56 = vmul.f32 %v967_v49, %v1567_v24  ;;  %v969_v63 = vld [vmem:[#allocation14 + $0x10] sm:$0xff]  ;;  %v974_v1 = vmul.f32 %v970_v59, %v1567_v24  ;;  %v1008_v4 = vld [vmem:[#allocation17 + $0x8] sm:$0xff] }
 0x10d   :  { %v973_v7 = vmul.f32 %v969_v63, %v1567_v24  ;;  %p1366_p11 = por %p1365_p10, %p1364_p9 }
 0x10f   :  { %p1367_p12 = pnand %p1366_p11, %p1360_p8 }
 0x182   :  { %v1162_v9 = vpop.f32.mrf.mxu0 }
 0x183   :  { %v279_v11 = vadd.f32 %v1162_v9, %v145_v8 }
 0x184   :  { %v259_v12 = vpop.f32.mrf.mxu0 }
 0x185   :  { %283 = vst.msk [vmem:[#allocation4 + $0x8] sm:$0xff] %vm107_vm1, %v279_v11  ;;  %v278_v13 = vadd.f32 %v259_v12, %v144_v10  ;;  %v1007_v10 = vld [vmem:[#allocation17] sm:$0xff] }
 0x187   :  { %282 = vst.msk [vmem:[#allocation4] sm:$0xff] %vm107_vm1, %v278_v13 }
 0x18a   :  { %v1165_v15 = vpop.f32.mrf.mxu0 }
 0x18b   :  { %v281_v17 = vadd.f32 %v1165_v15, %v147_v14  ;;  %v1012_v14 = vmul.f32 %v1008_v4, %v1567_v24  ;;  %v988_v15 = vld [vmem:[#allocation15 + $0x8] sm:$0xff] }
 0x18c   :  { %v269_v18 = vpop.f32.mrf.mxu0  ;;  %v601_v47 = vld [vmem:[#allocation4 + $0x8] sm:$0xff] }
 0x18d   :  { %285 = vst.msk [vmem:[#allocation4 + $0x18] sm:$0xff] %vm107_vm1, %v281_v17  ;;  %v280_v20 = vadd.f32 %v269_v18, %v146_v16  ;;  %v1010_v16 = vld [vmem:[#allocation17 + $0x18] sm:$0xff] }
 0x18e   :  { %v1178_v21 = vpop.f32.mrf.mxu0  ;;  %v600_v52 = vld [vmem:[#allocation4] sm:$0xff] }
 0x18f   :  { %284 = vst.msk [vmem:[#allocation4 + $0x10] sm:$0xff] %vm107_vm1, %v280_v20  ;;  %v517_v23 = vadd.f32 %v1178_v21, %v428_v19 }
 0x190   :  { %v497_v25 = vpop.f32.mrf.mxu0 }
 0x191   :  { %521 = vst.msk [vmem:[#allocation6 + $0x8] sm:$0xff] %vm107_vm1, %v517_v23  ;;  %v516_v29 = vadd.f32 %v497_v25, %v427_v22  ;;  %v1011_v22 = vmul.f32 %v1007_v10, %v1567_v24  ;;  %v987_v23 = vld [vmem:[#allocation15] sm:$0xff] }
 0x192   :  { %v1181_v30 = vpop.f32.mrf.mxu0  ;;  %v1170_v31 = vpop.f32.mrf.mxu1 }
 0x193   :  { %520 = vst.msk [vmem:[#allocation6] sm:$0xff] %vm107_vm1, %v516_v29  ;;  %v519_v34 = vadd.f32 %v1181_v30, %v430_v27  ;;  %v420_v35 = vadd.f32 %v1170_v31, %v287_v28  ;;  %v992_v28 = vmul.f32 %v988_v15, %v1567_v24  ;;  %v1014_v31 = vmul.f32 %v1010_v16, %v1567_v24 }
 0x194   :  { %v507_v36 = vpop.f32.mrf.mxu0  ;;  %v400_v37 = vpop.f32.mrf.mxu1  ;;  %v603_v61 = vld [vmem:[#allocation4 + $0x18] sm:$0xff] }
 0x195   :  { %523 = vst.msk [vmem:[#allocation6 + $0x18] sm:$0xff] %vm107_vm1, %v519_v34  ;;  %424 = vst.msk [vmem:[#allocation5 + $0x8] sm:$0xff] %vm107_vm1, %v420_v35  ;;  %v518_v38 = vadd.f32 %v507_v36, %v429_v32  ;;  %v419_v39 = vadd.f32 %v400_v37, %v286_v33  ;;  %v1009_v36 = vld [vmem:[#allocation17 + $0x10] sm:$0xff] }
 0x196   :  { %v602_v2 = vld [vmem:[#allocation4 + $0x10] sm:$0xff] }
 0x197   :  { %522 = vst.msk [vmem:[#allocation6 + $0x10] sm:$0xff] %vm107_vm1, %v518_v38  ;;  %423 = vst.msk [vmem:[#allocation5] sm:$0xff] %vm107_vm1, %v419_v39  ;;  %v991_v39 = vmul.f32 %v987_v23, %v1567_v24 }
 0x198   :  { %v875_v8 = vld [vmem:[#allocation6 + $0x8] sm:$0xff] }
 0x19a   :  { %v1173_v41 = vpop.f32.mrf.mxu1  ;;  %v874_v17 = vld [vmem:[#allocation6] sm:$0xff] }
 0x19b   :  { %v422_v43 = vadd.f32 %v1173_v41, %v289_v40 }
 0x19c   :  { %v410_v44 = vpop.f32.mrf.mxu1  ;;  %v738_v25 = vld [vmem:[#allocation5 + $0x8] sm:$0xff]  ;;  %v877_v29 = vld [vmem:[#allocation6 + $0x18] sm:$0xff] }
 0x19d   :  { %426 = vst.msk [vmem:[#allocation5 + $0x18] sm:$0xff] %vm107_vm1, %v422_v43  ;;  %v421_v45 = vadd.f32 %v410_v44, %v288_v42 }
 0x19e   :  { %v737_v37 = vld [vmem:[#allocation5] sm:$0xff] }
 0x19f   :  { %425 = vst.msk [vmem:[#allocation5 + $0x10] sm:$0xff] %vm107_vm1, %v421_v45 }
 0x1a1   :  { %v1186_v48 = vpop.f32.mrf.mxu1 }
 0x1a2   :  { %v734_v50 = vadd.f32 %v1186_v48, %v601_v47 }
 0x1a3   :  { %v714_v53 = vpop.f32.mrf.mxu1 }
 0x1a4   :  { %v976_v54 = vmul.f32 %v734_v50, %v1569_v26  ;;  %v733_v55 = vadd.f32 %v714_v53, %v600_v52 }
 0x1a6   :  { %v980_v57 = vadd.f32 %v976_v54, %v972_v51  ;;  %v975_v58 = vmul.f32 %v733_v55, %v1569_v26 }
 0x1a8   :  { %984 = vst.msk [vmem:[#allocation21 + $0x8] sm:$0xff] %vm107_vm1, %v980_v57  ;;  %v979_v60 = vadd.f32 %v975_v58, %v971_v56 }
 0x1a9   :  { %v1189_v62 = vpop.f32.mrf.mxu1 }
 0x1aa   :  { %983 = vst.msk [vmem:[#allocation21] sm:$0xff] %vm107_vm1, %v979_v60  ;;  %v736_v0 = vadd.f32 %v1189_v62, %v603_v61 }
 0x1ab   :  { %v724_v3 = vpop.f32.mrf.mxu1 }
 0x1ac   :  { %v978_v5 = vmul.f32 %v736_v0, %v1569_v26  ;;  %v735_v6 = vadd.f32 %v724_v3, %v602_v2 }
 0x1ad   :  { %v1202_v9 = vpop.f32.mrf.mxu1 }
 0x1ae   :  { %v982_v11 = vadd.f32 %v978_v5, %v974_v1  ;;  %v977_v12 = vmul.f32 %v735_v6, %v1569_v26  ;;  %v964_v13 = vadd.f32 %v1202_v9, %v875_v8 }
 0x1af   :  { %v944_v18 = vpop.f32.mrf.mxu1 }
 0x1b0   :  { %986 = vst.msk [vmem:[#allocation21 + $0x18] sm:$0xff] %vm107_vm1, %v982_v11  ;;  %v981_v19 = vadd.f32 %v977_v12, %v973_v7  ;;  %v1016_v20 = vmul.f32 %v964_v13, %v1569_v26  ;;  %v963_v21 = vadd.f32 %v944_v18, %v874_v17 }
 0x1b1   :  { %v1194_v27 = vpop.f32.mrf.mxu0  ;;  %v1205_v30 = vpop.f32.mrf.mxu1 }
 0x1b2   :  { %985 = vst.msk [vmem:[#allocation21 + $0x10] sm:$0xff] %vm107_vm1, %v981_v19  ;;  %v1020_v32 = vadd.f32 %v1016_v20, %v1012_v14  ;;  %v1015_v33 = vmul.f32 %v963_v21, %v1569_v26  ;;  %v871_v34 = vadd.f32 %v1194_v27, %v738_v25  ;;  %v966_v35 = vadd.f32 %v1205_v30, %v877_v29 }
 0x1b3   :  { %v851_v38 = vpop.f32.mrf.mxu0  ;;  %v954_v40 = vpop.f32.mrf.mxu1 }
 0x1b4   :  { %1370 = shalt.err (!%p1367_p12)
}
 0x1b5   :  { %1058 = dma.vmem_to_hbm [thread:$0]  %s1053_s9, 512, %s1692_s10, [#allocation20], %s1434_s14, %s1434_s14, %s1435_s15   ;;  %1024 = vst.msk [vmem:[#allocation24 + $0x8] sm:$0xff] %vm107_vm1, %v1020_v32  ;;  %v1019_v41 = vadd.f32 %v1015_v33, %v1011_v22  ;;  %v996_v42 = vmul.f32 %v871_v34, %v1569_v26  ;;  %v1018_v43 = vmul.f32 %v966_v35, %v1569_v26  ;;  %v870_v44 = vadd.f32 %v851_v38, %v737_v37  ;;  %v876_v45 = vld [vmem:[#allocation6 + $0x10] sm:$0xff]  ;;  %v990_v52 = vld [vmem:[#allocation15 + $0x18] sm:$0xff] }
 0x1b6   :  { %v965_v46 = vadd.f32 %v954_v40, %v876_v45  ;;  %v1013_v47 = vmul.f32 %v1009_v36, %v1567_v24  ;;  %v740_v55 = vld [vmem:[#allocation5 + $0x18] sm:$0xff]  ;;  %v994_v59 = vmul.f32 %v990_v52, %v1567_v24  ;;  %v739_v60 = vld [vmem:[#allocation5 + $0x10] sm:$0xff]  ;;  %s1442_s10 = smov [#allocation22]   ;;  %s1443_s7 = smov [#allocation24]  }
 0x1b7   :  { %1023 = vst.msk [vmem:[#allocation24] sm:$0xff] %vm107_vm1, %v1019_v41  ;;  %v1000_v48 = vadd.f32 %v996_v42, %v992_v28  ;;  %v1022_v49 = vadd.f32 %v1018_v43, %v1014_v31  ;;  %v995_v50 = vmul.f32 %v870_v44, %v1569_v26  ;;  %v989_v57 = vld [vmem:[#allocation15 + $0x10] sm:$0xff]  ;;  %s1064_s5 = sshll.u32 %s1442_s10, 4  ;;  %s1076_s29 = sshll.u32 %s1443_s7, 4  ;;  %s1065_s5 = int_to_ptr.vmem [resolvable:$true] %s1064_s5  ;;  %s1077_s29 = int_to_ptr.vmem [resolvable:$true] %s1076_s29 }
 0x1b8   :  { %v1017_v51 = vmul.f32 %v965_v46, %v1569_v26  ;;  %v993_v0 = vmul.f32 %v989_v57, %v1567_v24  ;;  %s1379_s30 = scalar_lea.vmem %s1065_s5, 512  ;;  %p1384_p0 = scmp.lt.s32.totalorder %s1065_s5, %s1065_s5 }
 0x1b9   :  { %1004 = vst.msk [vmem:[#allocation22 + $0x8] sm:$0xff] %vm107_vm1, %v1000_v48  ;;  %1026 = vst.msk [vmem:[#allocation24 + $0x18] sm:$0xff] %vm107_vm1, %v1022_v49  ;;  %v999_v53 = vadd.f32 %v995_v50, %v991_v39  ;;  %v1197_v56 = vpop.f32.mrf.mxu0  ;;  %p1380_p13 = scmp.ne.s32.totalorder %s1065_s5, %s1379_s30  ;;  %p1385_p1 = scmp.lt.s32.totalorder %s1379_s30, %s1379_s30 }
 0x1ba   :  { %v1021_v54 = vadd.f32 %v1017_v51, %v1013_v47  ;;  %v873_v58 = vadd.f32 %v1197_v56, %v740_v55 }
 0x1bb   :  { %1003 = vst.msk [vmem:[#allocation22] sm:$0xff] %vm107_vm1, %v999_v53  ;;  %v861_v61 = vpop.f32.mrf.mxu0  ;;  %p1386_p2 = por %p1385_p1, %p1384_p0 }
 0x1bc   :  { %1025 = vst.msk [vmem:[#allocation24 + $0x10] sm:$0xff] %vm107_vm1, %v1021_v54  ;;  %v998_v62 = vmul.f32 %v873_v58, %v1569_v26  ;;  %v872_v63 = vadd.f32 %v861_v61, %v739_v60 }
 0x1bd   :  { %p1387_p3 = pnand %p1386_p2, %p1380_p13 }
 0x1be   :  { %v1002_v1 = vadd.f32 %v998_v62, %v994_v59  ;;  %v997_v2 = vmul.f32 %v872_v63, %v1569_v26 }
 0x1c0   :  { %1006 = vst.msk [vmem:[#allocation22 + $0x18] sm:$0xff] %vm107_vm1, %v1002_v1  ;;  %v1001_v3 = vadd.f32 %v997_v2, %v993_v0 }
 0x1c2   :  { %1005 = vst.msk [vmem:[#allocation22 + $0x10] sm:$0xff] %vm107_vm1, %v1001_v3 }
 0x1c3   :  { %1390 = shalt.err (!%p1387_p3)
}
 0x1c4   :  { %1070 = dma.vmem_to_hbm [thread:$0]  %s1065_s5, 512, %s1693_s11, [#allocation23], %s1434_s14, %s1434_s14, %s1435_s15  }
 0x1c5   :  { %s1399_s13 = scalar_lea.vmem %s1077_s29, 512  ;;  %p1404_p5 = scmp.lt.s32.totalorder %s1077_s29, %s1077_s29 }
 0x1c6   :  { %p1400_p4 = scmp.ne.s32.totalorder %s1077_s29, %s1399_s13  ;;  %p1405_p6 = scmp.lt.s32.totalorder %s1399_s13, %s1399_s13 }
 0x1c8   :  { %p1406_p7 = por %p1405_p6, %p1404_p5 }
 0x1ca   :  { %p1407_p8 = pnand %p1406_p7, %p1400_p4 }
 0x1cc   :  { %1410 = shalt.err (!%p1407_p8)
}
 0x1cd   :  { %1082 = dma.vmem_to_hbm [thread:$0]  %s1077_s29, 512, %s1694_s12, [#allocation23], %s1434_s14, %s1434_s14, %s1435_s15  }
 0x1ce   :  { %1425 = dma.done.wait [#allocation11], 16  }
 0x1cf   :  { %1426 = vsyncadd [#allocation11], 4294967280 }
 0x1d0   :  { %1427 = dma.done.wait [#allocation20], 528  }
 0x1d1   :  { %1428 = vsyncadd [#allocation20], 4294966768 }
 0x1d2   :  { %1429 = dma.done.wait [#allocation23], 1024  }
 0x1d3   :  { %1430 = vsyncadd [#allocation23], 4294966272 }
 0x1d4   :  { %1098 = vsyncpa [#allocation10], 1 }
 0x1d5   :  { %1099 = vsyncpa [#allocation13], 1 }
 0x1d6   :  { %1100 = vsyncpa [#allocation16], 1 }
 0x1d7   :  { %1101 = vsyncpa [#allocation11], 1 }
 0x1d8   :  { %1102 = vsyncpa [#allocation20], 1 }
 0x1d9   :  { %1103 = vsyncpa [#allocation23], 1 }

</bundles_post_ra>
